<compile_context>
chip_gen: v6e
topology: v6e:2x2x1
jax: 0.10.0
libtpu: 0.0.40
codegen_flags: <defaults>
</compile_context>

<pallas_src>
import functools
import math

import jax
import jax.numpy as jnp
from jax import lax
from jax.experimental import pallas as pl
from jax.experimental.pallas import tpu as pltpu

_BN_EPS = 1e-5
_VMEM_LIMIT = 48 * 1024 * 1024


def _compiler_params():
    return pltpu.CompilerParams(
        dimension_semantics=("arbitrary",),
        vmem_limit_bytes=_VMEM_LIMIT,
    )


def _pad_axis(x, axis, mult, value=0.0):
    pad = (-x.shape[axis]) % mult
    if pad == 0:
        return x
    widths = [(0, 0)] * x.ndim
    widths[axis] = (0, pad)
    return jnp.pad(x, widths, constant_values=value)


# ---------------------------------------------------------------------------
# Fused GEMM (+bias [+residual] [+ReLU]) kernels — used for every conv+BN.
# ---------------------------------------------------------------------------
def _gemm_kernel(x_ref, w_ref, b_ref, o_ref, *, relu):
    acc = jnp.dot(x_ref[...], w_ref[...],
                  preferred_element_type=jnp.float32) + b_ref[...]
    if relu:
        acc = jnp.maximum(acc, 0.0)
    o_ref[...] = acc


def _gemm_res_kernel(x_ref, w_ref, b_ref, r_ref, o_ref, *, relu):
    acc = (jnp.dot(x_ref[...], w_ref[...],
                   preferred_element_type=jnp.float32)
           + b_ref[...] + r_ref[...])
    if relu:
        acc = jnp.maximum(acc, 0.0)
    o_ref[...] = acc


def _gemm(x, w, b, residual=None, relu=False):
    """(M,K) @ (K,N) + b (+residual) (+ReLU) as one single-block Pallas call."""
    m = x.shape[0]
    xp = _pad_axis(_pad_axis(x, 1, 128), 0, 8)      # lane-align K, sublane-align M
    wp = _pad_axis(w, 0, 128)
    mp, kp = xp.shape
    n = wp.shape[1]

    inputs = [xp, wp, b.reshape(1, n)]
    in_specs = [
        pl.BlockSpec((mp, kp), lambda i: (0, 0)),
        pl.BlockSpec((kp, n), lambda i: (0, 0)),
        pl.BlockSpec((1, n), lambda i: (0, 0)),
    ]
    if residual is not None:
        inputs.append(_pad_axis(residual, 0, 8))
        in_specs.append(pl.BlockSpec((mp, n), lambda i: (0, 0)))
        kernel = functools.partial(_gemm_res_kernel, relu=relu)
    else:
        kernel = functools.partial(_gemm_kernel, relu=relu)

    out = pl.pallas_call(
        kernel,
        out_shape=jax.ShapeDtypeStruct((mp, n), jnp.float32),
        grid=(1,),
        in_specs=in_specs,
        out_specs=pl.BlockSpec((mp, n), lambda i: (0, 0)),
        compiler_params=_compiler_params(),
    )(*inputs)
    return out[:m]


# ---------------------------------------------------------------------------
# Conv2d (bias=False) + inference BatchNorm (+ReLU) (+residual) via im2col.
# ---------------------------------------------------------------------------
def _extract_patches(x, k, stride, padding, pad_value=0.0):
    """x: (N,H,W,C) -> ((N,Ho,Wo,k*k*C), Ho, Wo); tap-major/channel ordering."""
    n, h, w, c = x.shape
    xp = jnp.pad(x, ((0, 0), (padding, padding), (padding, padding), (0, 0)),
                 constant_values=pad_value)
    ho = (h + 2 * padding - k) // stride + 1
    wo = (w + 2 * padding - k) // stride + 1
    taps = []
    for kh in range(k):
        for kw in range(k):
            taps.append(xp[:, kh:kh + stride * ho:stride,
                           kw:kw + stride * wo:stride, :])
    return jnp.concatenate(taps, axis=-1), ho, wo


def conv_bn_pallas(x, conv_w, bn, *, stride, padding, relu, residual=None):
    """x: (N,H,W,Cin), conv_w: (KH,KW,Cin,Cout) -> (N,Ho,Wo,Cout)."""
    n = x.shape[0]
    kh, kw, cin, cout = conv_w.shape
    assert kh == kw
    patches, ho, wo = _extract_patches(x, kh, stride, padding)
    pm = patches.reshape(n * ho * wo, kh * kw * cin)

    scale = bn['gamma'] / jnp.sqrt(bn['var'] + _BN_EPS)       # fold BN into GEMM
    wf = conv_w.reshape(kh * kw * cin, cout) * scale[None, :]
    bias = bn['beta'] - bn['mean'] * scale

    res = None
    if residual is not None:
        res = residual.reshape(n * ho * wo, cout)

    y = _gemm(pm, wf, bias, residual=res, relu=relu)
    return y.reshape(n, ho, wo, cout)


# ---------------------------------------------------------------------------
# MaxPool2d(kernel_size=3, stride=2, padding=1)
# ---------------------------------------------------------------------------
def _maxpool_kernel(x_ref, o_ref):
    o_ref[...] = jnp.max(x_ref[...], axis=0)


def maxpool_pallas(x, k=3, stride=2, padding=1):
    n, h, w, c = x.shape
    xp = jnp.pad(x, ((0, 0), (padding, padding), (padding, padding), (0, 0)),
                 constant_values=-jnp.inf)
    ho = (h + 2 * padding - k) // stride + 1
    wo = (w + 2 * padding - k) // stride + 1
    taps = [xp[:, i:i + stride * ho:stride, j:j + stride * wo:stride, :]
            for i in range(k) for j in range(k)]
    stacked = jnp.stack(taps, axis=0).reshape(k * k, n * ho * wo, c)
    m = n * ho * wo
    stacked = _pad_axis(stacked, 1, 8)
    mp = stacked.shape[1]

    out = pl.pallas_call(
        _maxpool_kernel,
        out_shape=jax.ShapeDtypeStruct((mp, c), jnp.float32),
        grid=(1,),
        in_specs=[pl.BlockSpec((k * k, mp, c), lambda i: (0, 0, 0))],
        out_specs=pl.BlockSpec((mp, c), lambda i: (0, 0)),
        compiler_params=_compiler_params(),
    )(stacked)
    return out[:m].reshape(n, ho, wo, c)


# ---------------------------------------------------------------------------
# Fused AT-2 head: AdaptiveAvgPool + alpha attention + beta attention + fusion.
# ---------------------------------------------------------------------------
def _at2_kernel(f_ref, wa_ref, ba_ref, wbv_ref, wbm_ref, bb_ref, o_ref):
    f = f_ref[...]                                   # (P, B, S, D)
    v = jnp.mean(f, axis=2)                          # (P, B, D)   avgpool(1)
    d = v.shape[-1]

    # alpha_i = sigmoid(Linear(512->1)(v_i)) as a lane reduction.
    a_logit = jnp.sum(v * wa_ref[...], axis=-1, keepdims=True) + ba_ref[...]
    alpha = jax.nn.sigmoid(a_logit)                  # (P, B, 1)

    vm1 = jnp.sum(v * alpha, axis=0) / jnp.sum(alpha, axis=0)        # (B, D)

    # beta_i = sigmoid(Linear(1024->1)([v_i, vm1])) with split weight (no concat).
    b_logit = (jnp.sum(v * wbv_ref[...], axis=-1, keepdims=True)
               + jnp.sum(vm1 * wbm_ref[...], axis=-1, keepdims=True)
               + bb_ref[...])
    beta = jax.nn.sigmoid(b_logit)                   # (P, B, 1)

    wgt = alpha * beta                               # (P, B, 1)
    wsum = jnp.sum(wgt, axis=0)                      # (B, 1)
    out_v = jnp.sum(v * wgt, axis=0) / wsum          # (B, D)  first half of cat
    # Second half of cat: sum_i(vm1 * w_i) / sum_i(w_i) == vm1 exactly.
    o_ref[:, :d] = out_v
    o_ref[:, d:] = vm1


def at2_attention_pallas(feat, alpha_w, alpha_b, beta_w, beta_b, num_pair, batch):
    pb, ho, wo, d = feat.shape
    assert pb == num_pair * batch
    f = feat.reshape(num_pair, batch, ho * wo, d)
    wa = alpha_w.reshape(1, d)
    ba = alpha_b.reshape(1, 1)
    wbv = beta_w[:, :d].reshape(1, d)
    wbm = beta_w[:, d:].reshape(1, d)
    bb = beta_b.reshape(1, 1)

    return pl.pallas_call(
        _at2_kernel,
        out_shape=jax.ShapeDtypeStruct((batch, 2 * d), jnp.float32),
        grid=(1,),
        in_specs=[
            pl.BlockSpec((num_pair, batch, ho * wo, d), lambda i: (0, 0, 0, 0)),
            pl.BlockSpec((1, d), lambda i: (0, 0)),
            pl.BlockSpec((1, 1), lambda i: (0, 0)),
            pl.BlockSpec((1, d), lambda i: (0, 0)),
            pl.BlockSpec((1, d), lambda i: (0, 0)),
            pl.BlockSpec((1, 1), lambda i: (0, 0)),
        ],
        out_specs=pl.BlockSpec((batch, 2 * d), lambda i: (0, 0)),
        compiler_params=_compiler_params(),
    )(f, wa, ba, wbv, wbm, bb)


# ---------------------------------------------------------------------------
# ResNet_AT forward (train phase, AT-2) built from the Pallas kernels above.
# ---------------------------------------------------------------------------
def basic_block_pallas(x, blk):
    stride = blk['stride']
    if blk['downsample'] is not None:
        ds = blk['downsample']
        identity = conv_bn_pallas(x, ds['w'], ds['bn'],
                                  stride=stride, padding=0, relu=False)
    else:
        identity = x
    out = conv_bn_pallas(x, blk['conv1_w'], blk['bn1'],
                         stride=stride, padding=1, relu=True)
    out = conv_bn_pallas(out, blk['conv2_w'], blk['bn2'],
                         stride=1, padding=1, relu=True, residual=identity)
    return out


def resnet_at_forward_pallas(x, params):
    """x: (B, 3, H, W, num_pair) -> pred_score (B, 1024, 1, 1)."""
    b, cin, h, w, num_pair = x.shape
    f = jnp.transpose(x, (4, 0, 2, 3, 1)).reshape(num_pair * b, h, w, cin)
    f = f.astype(jnp.float32)

    f = conv_bn_pallas(f, params['conv1_w'], params['bn1'],
                       stride=2, padding=3, relu=True)
    f = maxpool_pallas(f)
    for layer in params['layers']:
        for blk in layer:
            f = basic_block_pallas(f, blk)

    out = at2_attention_pallas(f, params['alpha_w'], params['alpha_b'],
                               params['beta_w'], params['beta_b'], num_pair, b)
    return out.reshape(b, out.shape[1], 1, 1)


# ---------------------------------------------------------------------------
# Pure-JAX reference (lax.conv / reduce_window) mirroring the PyTorch module.
# ---------------------------------------------------------------------------
def _conv_ref(x, w, stride, padding):
    return lax.conv_general_dilated(
        x, w, window_strides=(stride, stride),
        padding=[(padding, padding), (padding, padding)],
        dimension_numbers=('NHWC', 'HWIO', 'NHWC'),
        precision=lax.Precision.HIGHEST)


def _bn_ref(x, bn):
    return (x - bn['mean']) / jnp.sqrt(bn['var'] + _BN_EPS) * bn['gamma'] + bn['beta']


def _block_ref(x, blk):
    stride = blk['stride']
    identity = x
    if blk['downsample'] is not None:
        ds = blk['downsample']
        identity = _bn_ref(_conv_ref(x, ds['w'], stride, 0), ds['bn'])
    out = jax.nn.relu(_bn_ref(_conv_ref(x, blk['conv1_w'], stride, 1), blk['bn1']))
    out = _bn_ref(_conv_ref(out, blk['conv2_w'], 1, 1), blk['bn2'])
    return jax.nn.relu(out + identity)


def resnet_at_forward_ref(x, params):
    b, cin, h, w, num_pair = x.shape
    f = jnp.transpose(x, (4, 0, 2, 3, 1)).reshape(num_pair * b, h, w, cin)
    f = f.astype(jnp.float32)
    f = jax.nn.relu(_bn_ref(_conv_ref(f, params['conv1_w'], 2, 3), params['bn1']))
    f = lax.reduce_window(f, -jnp.inf, lax.max, (1, 3, 3, 1), (1, 2, 2, 1),
                          [(0, 0), (1, 1), (1, 1), (0, 0)])
    for layer in params['layers']:
        for blk in layer:
            f = _block_ref(f, blk)
    v = jnp.mean(f, axis=(1, 2)).reshape(num_pair, b, -1)            # (P, B, 512)
    alpha = jax.nn.sigmoid(v @ params['alpha_w'].T + params['alpha_b'])
    vm1 = jnp.sum(v * alpha, axis=0) / jnp.sum(alpha, axis=0)        # (B, 512)
    cat = jnp.concatenate([v, jnp.broadcast_to(vm1[None], v.shape)], axis=-1)
    beta = jax.nn.sigmoid(cat @ params['beta_w'].T + params['beta_b'])
    wgt = alpha * beta
    out = jnp.sum(cat * wgt, axis=0) / jnp.sum(wgt, axis=0)          # (B, 1024)
    return out.reshape(b, out.shape[1], 1, 1)


# ---------------------------------------------------------------------------
# Parameter construction matching the module's init (BasicBlock backbone).
# ---------------------------------------------------------------------------
def init_params(key, layers_cfg=(1, 1, 1, 1)):
    def conv_init(k, kh, kw, cin, cout):
        n = kh * kw * cout                            # normal(0, sqrt(2/n))
        return jax.random.normal(k, (kh, kw, cin, cout), jnp.float32) * math.sqrt(2.0 / n)

    def bn_init(c):
        return {'gamma': jnp.ones((c,), jnp.float32),
                'beta': jnp.zeros((c,), jnp.float32),
                'mean': jnp.zeros((c,), jnp.float32),
                'var': jnp.ones((c,), jnp.float32)}

    keys = iter(jax.random.split(key, 64))
    params = {'conv1_w': conv_init(next(keys), 7, 7, 3, 64), 'bn1': bn_init(64)}

    inplanes = 64
    layers = []
    for planes, nblocks, stride in zip((64, 128, 256, 512), layers_cfg, (1, 2, 2, 2)):
        blocks = []
        for bi in range(nblocks):
            s = stride if bi == 0 else 1
            blk = {'stride': s,
                   'conv1_w': conv_init(next(keys), 3, 3, inplanes, planes),
                   'bn1': bn_init(planes),
                   'conv2_w': conv_init(next(keys), 3, 3, planes, planes),
                   'bn2': bn_init(planes),
                   'downsample': None}
            if s != 1 or inplanes != planes:
                blk['downsample'] = {'w': conv_init(next(keys), 1, 1, inplanes, planes),
                                     'bn': bn_init(planes)}
            blocks.append(blk)
            inplanes = planes
        layers.append(blocks)
    params['layers'] = layers

    k1, k2, k3, k4 = jax.random.split(next(keys), 4)
    b512, b1024 = 1.0 / math.sqrt(512.0), 1.0 / math.sqrt(1024.0)
    params['alpha_w'] = jax.random.uniform(k1, (1, 512), jnp.float32, -b512, b512)
    params['alpha_b'] = jax.random.uniform(k2, (1,), jnp.float32, -b512, b512)
    params['beta_w'] = jax.random.uniform(k3, (1, 1024), jnp.float32, -b1024, b1024)
    params['beta_b'] = jax.random.uniform(k4, (1,), jnp.float32, -b1024, b1024)
    # pred_fc1 / pred_fc2 are not used by the train-phase AT-2 forward path.
    return params


if __name__ == "__main__":
    layers_cfg = (1, 1, 1, 1)            # BasicBlock count per stage (small ResNet)
    key = jax.random.PRNGKey(0)
    kp, kx = jax.random.split(key)
    params = init_params(kp, layers_cfg)

    batch, height, width, num_pair = 2, 16, 16, 3
    x = jax.random.normal(kx, (batch, 3, height, width, num_pair), jnp.float32)

    out = jax.block_until_ready(resnet_at_forward_pallas(x, params))
    ref = jax.block_until_ready(resnet_at_forward_ref(x, params))

    assert out.shape == (batch, 1024, 1, 1), out.shape
    max_err = float(jnp.max(jnp.abs(out - ref)))
    assert jnp.allclose(out, ref, rtol=5e-3, atol=5e-3), max_err
    print("KERNEL_OK")
</pallas_src>

<mosaic_0001>
module attributes {stable_mosaic.version = 11 : i64} {
  func.func @_gemm_kernel(%arg0: i32, %arg1: memref<384x256xf32, #tpu.memory_space<vmem>>, %arg2: memref<256x64xf32, #tpu.memory_space<vmem>>, %arg3: memref<1x64xf32, #tpu.memory_space<vmem>>, %arg4: memref<384x64xf32, #tpu.memory_space<vmem>>) attributes {dimension_semantics = [#tpu.dimension_semantics<arbitrary>], iteration_bounds = array<i64: 1>, scalar_prefetch = 0 : i64, scratch_operands = 0 : i64, tpu.core_type = #tpu.core_type<tc>, window_params = [{pipeline_mode = #tpu.pipeline_mode<synchronous>, transform_indices = @transform_0, window_bounds = array<i64: 384, 256>}, {pipeline_mode = #tpu.pipeline_mode<synchronous>, transform_indices = @transform_1, window_bounds = array<i64: 256, 64>}, {pipeline_mode = #tpu.pipeline_mode<synchronous>, transform_indices = @transform_2, window_bounds = array<i64: 1, 64>}, {pipeline_mode = #tpu.pipeline_mode<synchronous>, transform_indices = @transform_3, window_bounds = array<i64: 384, 64>}]} {
    %c0 = arith.constant 0 : index
    %c0_0 = arith.constant 0 : index
    %0 = vector.load %arg1[%c0, %c0_0] : memref<384x256xf32, #tpu.memory_space<vmem>>, vector<384x256xf32>
    %c0_1 = arith.constant 0 : index
    %c0_2 = arith.constant 0 : index
    %1 = vector.load %arg2[%c0_1, %c0_2] : memref<256x64xf32, #tpu.memory_space<vmem>>, vector<256x64xf32>
    %cst = arith.constant dense<0.000000e+00> : vector<384x64xf32>
    %2 = tpu.matmul %0, %1, %cst {dimension_numbers = #tpu.dot_dimension_numbers<[1], [0], [0], [1], [0, 0, 1, 1], [], []>} : vector<384x256xf32>, vector<256x64xf32>, vector<384x64xf32> -> vector<384x64xf32>
    %c0_3 = arith.constant 0 : index
    %c0_4 = arith.constant 0 : index
    %3 = vector.load %arg3[%c0_3, %c0_4] : memref<1x64xf32, #tpu.memory_space<vmem>>, vector<1x64xf32>
    %4 = vector.broadcast %3 : vector<1x64xf32> to vector<384x64xf32>
    %5 = arith.addf %2, %4 : vector<384x64xf32>
    %cst_5 = arith.constant 0.000000e+00 : f32
    %6 = vector.broadcast %cst_5 : f32 to vector<384x64xf32>
    %7 = arith.maximumf %5, %6 : vector<384x64xf32>
    %c0_6 = arith.constant 0 : index
    %c0_7 = arith.constant 0 : index
    %8 = vector.load %arg4[%c0_6, %c0_7] : memref<384x64xf32, #tpu.memory_space<vmem>>, vector<384x64xf32>
    tpu.vector_store %arg4[%c0_6, %c0_7], %7 {strides = array<i32>} : memref<384x64xf32, #tpu.memory_space<vmem>>, vector<384x64xf32>,
    return
  }
  func.func @transform_0(%arg0: i32) -> (i32, i32) {
    %c0_i32 = arith.constant 0 : i32
    %c0_i32_0 = arith.constant 0 : i32
    %c0_i32_1 = arith.constant 0 : i32
    return %c0_i32, %c0_i32_0 : i32, i32
  }
  func.func @transform_1(%arg0: i32) -> (i32, i32) {
    %c0_i32 = arith.constant 0 : i32
    %c0_i32_0 = arith.constant 0 : i32
    %c0_i32_1 = arith.constant 0 : i32
    return %c0_i32, %c0_i32_0 : i32, i32
  }
  func.func @transform_2(%arg0: i32) -> (i32, i32) {
    %c0_i32 = arith.constant 0 : i32
    %c0_i32_0 = arith.constant 0 : i32
    %c0_i32_1 = arith.constant 0 : i32
    return %c0_i32, %c0_i32_0 : i32, i32
  }
  func.func @transform_3(%arg0: i32) -> (i32, i32) {
    %c0_i32 = arith.constant 0 : i32
    %c0_i32_0 = arith.constant 0 : i32
    %c0_i32_1 = arith.constant 0 : i32
    return %c0_i32, %c0_i32_0 : i32, i32
  }
}

</mosaic_0001>

<bundles_post_ra>
// kernel: tpu_custom_call.1
= control target key start
LH: loop header
LB: loop body
LE: loop exit
PB: predicated region body
PF: predicated region fallthrough
CT: control target
= control target key end

     0   :  { %8 = vsyncpa [#allocation3], 0  ;;  %s661_s12 = smov [#allocation2]   ;;  %s1093_s0 = inlined_call_operand.hbm [shape: f32[384,256], index: 0, kind: input, shape index: {}]   ;;  %s1094_s1 = inlined_call_operand.vmem [shape: f32[256,64], index: 1, kind: input, shape index: {}]   ;;  %s1095_s2 = inlined_call_operand.vmem [shape: f32[1,64], index: 2, kind: input, shape index: {}]   ;;  %s1096_s3 = inlined_call_operand.vmem [shape: f32[384,64], index: 3, kind: output, shape index: {}]  }
   0x1   :  { %s14_s13 = sshll.u32 %s661_s12, 4  ;;  %s15_s13 = int_to_ptr.vmem [resolvable:$true] %s14_s13 }
   0x2   :  { %s647_s14 = scalar_lea.vmem %s15_s13, 12288  ;;  %p652_p1 = scmp.lt.s32.totalorder %s15_s13, %s15_s13 }
   0x3   :  { %p648_p0 = scmp.ne.s32.totalorder %s15_s13, %s647_s14  ;;  %p653_p2 = scmp.lt.s32.totalorder %s647_s14, %s647_s14 }
   0x5   :  { %p654_p3 = por %p653_p2, %p652_p1 }
   0x7   :  { %p655_p4 = pnand %p654_p3, %p648_p0 }
   0x9   :  { %658 = shalt.err (!%p655_p4)
}
   0xa   :  { %s662_s15 = smov 256   ;;  %s663_s16 = smov 16  }
   0xb   :  { %20 = dma.hbm_to_vmem [thread:$0]  %s1093_s0, 12288, %s15_s13, [#allocation3], %s662_s15, %s662_s15, %s663_s16  }
   0xc   :  { %659 = dma.done.wait [#allocation3], 12288  }
   0xd   :  { %660 = vsyncadd [#allocation3], 4294955008  ;;  %v664_v0 = vmov 0.0   ;;  %v139_v1 = vld [vmem:[%s1094_s1 + $0x78] sm:$0xff]  ;;  %v138_v2 = vld [vmem:[%s1094_s1 + $0x70] sm:$0xff]  ;;  %vm516_vm0 = vcmask 523264  }
   0xe   :  { %163 = vmatprep.subr.mxu0 %v664_v0  ;;  %571 = vmatprep.subr.mxu1 %v664_v0  ;;  %v137_v3 = vld [vmem:[%s1094_s1 + $0x68] sm:$0xff]  ;;  %v136_v4 = vld [vmem:[%s1094_s1 + $0x60] sm:$0xff]  ;;  %v135_v5 = vld [vmem:[%s1094_s1 + $0x58] sm:$0xff] }
   0xf   :  { %164 = vmatpush1.msra.mxu0 %v139_v1  ;;  %603 = vmatpush1.msra.mxu1 %v139_v1  ;;  %v134_v6 = vld [vmem:[%s1094_s1 + $0x50] sm:$0xff]  ;;  %v133_v7 = vld [vmem:[%s1094_s1 + $0x48] sm:$0xff]  ;;  %v132_v8 = vld [vmem:[%s1094_s1 + $0x40] sm:$0xff] }
  0x10   :  { %165 = vmatprep.subr.mxu0 %v664_v0  ;;  %572 = vmatprep.subr.mxu1 %v664_v0  ;;  %v131_v9 = vld [vmem:[%s1094_s1 + $0x38] sm:$0xff]  ;;  %v130_v10 = vld [vmem:[%s1094_s1 + $0x30] sm:$0xff]  ;;  %v129_v11 = vld [vmem:[%s1094_s1 + $0x28] sm:$0xff] }
  0x11   :  { %166 = vmatpush1.msra.mxu0 %v138_v2  ;;  %604 = vmatpush1.msra.mxu1 %v138_v2  ;;  %v128_v12 = vld [vmem:[%s1094_s1 + $0x20] sm:$0xff]  ;;  %v127_v13 = vld [vmem:[%s1094_s1 + $0x18] sm:$0xff]  ;;  %v126_v14 = vld [vmem:[%s1094_s1 + $0x10] sm:$0xff] }
  0x12   :  { %167 = vmatprep.subr.mxu0 %v664_v0  ;;  %573 = vmatprep.subr.mxu1 %v664_v0  ;;  %v125_v15 = vld [vmem:[%s1094_s1 + $0x8] sm:$0xff]  ;;  %v124_v16 = vld [vmem:[%s1094_s1] sm:$0xff]  ;;  %v155_v17 = vld [vmem:[%s1094_s1 + $0xf8] sm:$0xff] }
  0x13   :  { %168 = vmatpush1.msra.mxu0 %v137_v3  ;;  %605 = vmatpush1.msra.mxu1 %v137_v3  ;;  %v154_v18 = vld [vmem:[%s1094_s1 + $0xf0] sm:$0xff]  ;;  %v153_v19 = vld [vmem:[%s1094_s1 + $0xe8] sm:$0xff]  ;;  %v152_v20 = vld [vmem:[%s1094_s1 + $0xe0] sm:$0xff] }
  0x14   :  { %169 = vmatprep.subr.mxu0 %v664_v0  ;;  %574 = vmatprep.subr.mxu1 %v664_v0  ;;  %v151_v21 = vld [vmem:[%s1094_s1 + $0xd8] sm:$0xff]  ;;  %v150_v22 = vld [vmem:[%s1094_s1 + $0xd0] sm:$0xff]  ;;  %v149_v23 = vld [vmem:[%s1094_s1 + $0xc8] sm:$0xff] }
  0x15   :  { %170 = vmatpush1.msra.mxu0 %v136_v4  ;;  %606 = vmatpush1.msra.mxu1 %v136_v4  ;;  %v148_v24 = vld [vmem:[%s1094_s1 + $0xc0] sm:$0xff]  ;;  %v147_v25 = vld [vmem:[%s1094_s1 + $0xb8] sm:$0xff]  ;;  %v146_v26 = vld [vmem:[%s1094_s1 + $0xb0] sm:$0xff] }
  0x16   :  { %171 = vmatprep.subr.mxu0 %v664_v0  ;;  %575 = vmatprep.subr.mxu1 %v664_v0  ;;  %v145_v27 = vld [vmem:[%s1094_s1 + $0xa8] sm:$0xff]  ;;  %v144_v28 = vld [vmem:[%s1094_s1 + $0xa0] sm:$0xff]  ;;  %v143_v29 = vld [vmem:[%s1094_s1 + $0x98] sm:$0xff] }
  0x17   :  { %172 = vmatpush1.msra.mxu0 %v135_v5  ;;  %607 = vmatpush1.msra.mxu1 %v135_v5  ;;  %v142_v30 = vld [vmem:[%s1094_s1 + $0x90] sm:$0xff]  ;;  %v141_v31 = vld [vmem:[%s1094_s1 + $0x88] sm:$0xff]  ;;  %v140_v32 = vld [vmem:[%s1094_s1 + $0x80] sm:$0xff] }
  0x18   :  { %173 = vmatprep.subr.mxu0 %v664_v0  ;;  %576 = vmatprep.subr.mxu1 %v664_v0  ;;  %v29_v33 = vld [vmem:[#allocation2 + $0x8] sm:$0xff]  ;;  %v28_v35 = vld [vmem:[#allocation2] sm:$0xff]  ;;  %v31_v37 = vld [vmem:[#allocation2 + $0x18] sm:$0xff] }
  0x19   :  { %174 = vmatpush1.msra.mxu0 %v134_v6  ;;  %608 = vmatpush1.msra.mxu1 %v134_v6  ;;  %v77_v34 = vld [vmem:[#allocation2 + $0x188] sm:$0xff]  ;;  %v76_v36 = vld [vmem:[#allocation2 + $0x180] sm:$0xff]  ;;  %v79_v38 = vld [vmem:[#allocation2 + $0x198] sm:$0xff] }
  0x1a   :  { %175 = vmatprep.subr.mxu0 %v664_v0  ;;  %577 = vmatprep.subr.mxu1 %v664_v0  ;;  %v30_v39 = vld [vmem:[#allocation2 + $0x10] sm:$0xff]  ;;  %v33_v41 = vld [vmem:[#allocation2 + $0x28] sm:$0xff]  ;;  %v32_v43 = vld [vmem:[#allocation2 + $0x20] sm:$0xff] }
  0x1b   :  { %176 = vmatpush1.msra.mxu0 %v133_v7  ;;  %609 = vmatpush1.msra.mxu1 %v133_v7  ;;  %v78_v40 = vld [vmem:[#allocation2 + $0x190] sm:$0xff]  ;;  %v81_v42 = vld [vmem:[#allocation2 + $0x1a8] sm:$0xff]  ;;  %v80_v44 = vld [vmem:[#allocation2 + $0x1a0] sm:$0xff] }
  0x1c   :  { %177 = vmatprep.subr.mxu0 %v664_v0  ;;  %578 = vmatprep.subr.mxu1 %v664_v0  ;;  %v35_v45 = vld [vmem:[#allocation2 + $0x38] sm:$0xff]  ;;  %v34_v47 = vld [vmem:[#allocation2 + $0x30] sm:$0xff]  ;;  %v37_v49 = vld [vmem:[#allocation2 + $0x48] sm:$0xff] }
  0x1d   :  { %178 = vmatpush1.msra.mxu0 %v132_v8  ;;  %610 = vmatpush1.msra.mxu1 %v132_v8  ;;  %v83_v46 = vld [vmem:[#allocation2 + $0x1b8] sm:$0xff]  ;;  %v82_v48 = vld [vmem:[#allocation2 + $0x1b0] sm:$0xff]  ;;  %v85_v50 = vld [vmem:[#allocation2 + $0x1c8] sm:$0xff] }
  0x1e   :  { %179 = vmatprep.subr.mxu0 %v664_v0  ;;  %579 = vmatprep.subr.mxu1 %v664_v0  ;;  %v36_v51 = vld [vmem:[#allocation2 + $0x40] sm:$0xff]  ;;  %v39_v53 = vld [vmem:[#allocation2 + $0x58] sm:$0xff]  ;;  %v38_v55 = vld [vmem:[#allocation2 + $0x50] sm:$0xff] }
  0x1f   :  { %180 = vmatpush1.msra.mxu0 %v131_v9  ;;  %611 = vmatpush1.msra.mxu1 %v131_v9  ;;  %v84_v52 = vld [vmem:[#allocation2 + $0x1c0] sm:$0xff]  ;;  %v87_v54 = vld [vmem:[#allocation2 + $0x1d8] sm:$0xff]  ;;  %v86_v56 = vld [vmem:[#allocation2 + $0x1d0] sm:$0xff] }
  0x20   :  { %181 = vmatprep.subr.mxu0 %v664_v0  ;;  %580 = vmatprep.subr.mxu1 %v664_v0  ;;  %v41_v57 = vld [vmem:[#allocation2 + $0x68] sm:$0xff]  ;;  %v40_v59 = vld [vmem:[#allocation2 + $0x60] sm:$0xff]  ;;  %v43_v61 = vld [vmem:[#allocation2 + $0x78] sm:$0xff] }
  0x21   :  { %182 = vmatpush1.msra.mxu0 %v130_v10  ;;  %612 = vmatpush1.msra.mxu1 %v130_v10  ;;  %v89_v58 = vld [vmem:[#allocation2 + $0x1e8] sm:$0xff]  ;;  %v88_v60 = vld [vmem:[#allocation2 + $0x1e0] sm:$0xff]  ;;  %v91_v62 = vld [vmem:[#allocation2 + $0x1f8] sm:$0xff] }
  0x22   :  { %183 = vmatprep.subr.mxu0 %v664_v0  ;;  %581 = vmatprep.subr.mxu1 %v664_v0  ;;  %v42_v63 = vld [vmem:[#allocation2 + $0x70] sm:$0xff]  ;;  %v45_v1 = vld [vmem:[#allocation2 + $0x88] sm:$0xff]  ;;  %v44_v3 = vld [vmem:[#allocation2 + $0x80] sm:$0xff] }
  0x23   :  { %184 = vmatpush1.msra.mxu0 %v129_v11  ;;  %613 = vmatpush1.msra.mxu1 %v129_v11  ;;  %v93_v2 = vld [vmem:[#allocation2 + $0x208] sm:$0xff]  ;;  %v92_v4 = vld [vmem:[#allocation2 + $0x200] sm:$0xff]  ;;  %v47_v5 = vld [vmem:[#allocation2 + $0x98] sm:$0xff] }
  0x24   :  { %185 = vmatprep.subr.mxu0 %v664_v0  ;;  %582 = vmatprep.subr.mxu1 %v664_v0  ;;  %v95_v6 = vld [vmem:[#allocation2 + $0x218] sm:$0xff]  ;;  %v46_v7 = vld [vmem:[#allocation2 + $0x90] sm:$0xff]  ;;  %v49_v9 = vld [vmem:[#allocation2 + $0xa8] sm:$0xff] }
  0x25   :  { %186 = vmatpush1.msra.mxu0 %v128_v12  ;;  %614 = vmatpush1.msra.mxu1 %v128_v12  ;;  %v94_v8 = vld [vmem:[#allocation2 + $0x210] sm:$0xff]  ;;  %v97_v10 = vld [vmem:[#allocation2 + $0x228] sm:$0xff]  ;;  %v48_v11 = vld [vmem:[#allocation2 + $0xa0] sm:$0xff] }
  0x26   :  { %187 = vmatprep.subr.mxu0 %v664_v0  ;;  %583 = vmatprep.subr.mxu1 %v664_v0  ;;  %v96_v12 = vld [vmem:[#allocation2 + $0x220] sm:$0xff] }
  0x27   :  { %188 = vmatpush1.msra.mxu0 %v127_v13  ;;  %615 = vmatpush1.msra.mxu1 %v127_v13  ;;  %v51_v13 = vld [vmem:[#allocation2 + $0xb8] sm:$0xff] }
  0x28   :  { %189 = vmatprep.subr.mxu0 %v664_v0  ;;  %584 = vmatprep.subr.mxu1 %v664_v0 }
  0x29   :  { %190 = vmatpush1.msra.mxu0 %v126_v14  ;;  %616 = vmatpush1.msra.mxu1 %v126_v14  ;;  %v99_v14 = vld [vmem:[#allocation2 + $0x238] sm:$0xff] }
  0x2a   :  { %191 = vmatprep.subr.mxu0 %v664_v0  ;;  %585 = vmatprep.subr.mxu1 %v664_v0 }
  0x2b   :  { %192 = vmatpush1.msra.mxu0 %v125_v15  ;;  %617 = vmatpush1.msra.mxu1 %v125_v15  ;;  %v50_v15 = vld [vmem:[#allocation2 + $0xb0] sm:$0xff] }
  0x2c   :  { %193 = vmatprep.subr.mxu0 %v664_v0  ;;  %586 = vmatprep.subr.mxu1 %v664_v0 }
  0x2d   :  { %194 = vmatpush1.msra.mxu0 %v124_v16  ;;  %618 = vmatpush1.msra.mxu1 %v124_v16  ;;  %v98_v16 = vld [vmem:[#allocation2 + $0x230] sm:$0xff] }
  0x2e   :  { %195 = vmatprep.subr.mxu0 %v664_v0  ;;  %587 = vmatprep.subr.mxu1 %v664_v0 }
  0x2f   :  { %196 = vmatpush2.msra.mxu0 %v155_v17  ;;  %619 = vmatpush2.msra.mxu1 %v155_v17  ;;  %v53_v17 = vld [vmem:[#allocation2 + $0xc8] sm:$0xff] }
  0x30   :  { %197 = vmatprep.subr.mxu0 %v664_v0  ;;  %588 = vmatprep.subr.mxu1 %v664_v0 }
  0x31   :  { %198 = vmatpush2.msra.mxu0 %v154_v18  ;;  %620 = vmatpush2.msra.mxu1 %v154_v18  ;;  %v101_v18 = vld [vmem:[#allocation2 + $0x248] sm:$0xff] }
  0x32   :  { %199 = vmatprep.subr.mxu0 %v664_v0  ;;  %589 = vmatprep.subr.mxu1 %v664_v0 }
  0x33   :  { %200 = vmatpush2.msra.mxu0 %v153_v19  ;;  %621 = vmatpush2.msra.mxu1 %v153_v19  ;;  %v52_v19 = vld [vmem:[#allocation2 + $0xc0] sm:$0xff] }
  0x34   :  { %201 = vmatprep.subr.mxu0 %v664_v0  ;;  %590 = vmatprep.subr.mxu1 %v664_v0 }
  0x35   :  { %202 = vmatpush2.msra.mxu0 %v152_v20  ;;  %622 = vmatpush2.msra.mxu1 %v152_v20  ;;  %v100_v20 = vld [vmem:[#allocation2 + $0x240] sm:$0xff] }
  0x36   :  { %203 = vmatprep.subr.mxu0 %v664_v0  ;;  %591 = vmatprep.subr.mxu1 %v664_v0 }
  0x37   :  { %204 = vmatpush2.msra.mxu0 %v151_v21  ;;  %623 = vmatpush2.msra.mxu1 %v151_v21  ;;  %v55_v21 = vld [vmem:[#allocation2 + $0xd8] sm:$0xff] }
  0x38   :  { %205 = vmatprep.subr.mxu0 %v664_v0  ;;  %592 = vmatprep.subr.mxu1 %v664_v0 }
  0x39   :  { %206 = vmatpush2.msra.mxu0 %v150_v22  ;;  %624 = vmatpush2.msra.mxu1 %v150_v22  ;;  %v103_v22 = vld [vmem:[#allocation2 + $0x258] sm:$0xff] }
  0x3a   :  { %207 = vmatprep.subr.mxu0 %v664_v0  ;;  %593 = vmatprep.subr.mxu1 %v664_v0 }
  0x3b   :  { %208 = vmatpush2.msra.mxu0 %v149_v23  ;;  %625 = vmatpush2.msra.mxu1 %v149_v23  ;;  %v54_v23 = vld [vmem:[#allocation2 + $0xd0] sm:$0xff] }
  0x3c   :  { %209 = vmatprep.subr.mxu0 %v664_v0  ;;  %594 = vmatprep.subr.mxu1 %v664_v0 }
  0x3d   :  { %210 = vmatpush2.msra.mxu0 %v148_v24  ;;  %626 = vmatpush2.msra.mxu1 %v148_v24  ;;  %v102_v24 = vld [vmem:[#allocation2 + $0x250] sm:$0xff] }
  0x3e   :  { %211 = vmatprep.subr.mxu0 %v664_v0  ;;  %595 = vmatprep.subr.mxu1 %v664_v0 }
  0x3f   :  { %212 = vmatpush2.msra.mxu0 %v147_v25  ;;  %627 = vmatpush2.msra.mxu1 %v147_v25  ;;  %v57_v25 = vld [vmem:[#allocation2 + $0xe8] sm:$0xff] }
  0x40   :  { %213 = vmatprep.subr.mxu0 %v664_v0  ;;  %596 = vmatprep.subr.mxu1 %v664_v0 }
  0x41   :  { %214 = vmatpush2.msra.mxu0 %v146_v26  ;;  %628 = vmatpush2.msra.mxu1 %v146_v26  ;;  %v105_v26 = vld [vmem:[#allocation2 + $0x268] sm:$0xff] }
  0x42   :  { %215 = vmatprep.subr.mxu0 %v664_v0  ;;  %597 = vmatprep.subr.mxu1 %v664_v0 }
  0x43   :  { %216 = vmatpush2.msra.mxu0 %v145_v27  ;;  %629 = vmatpush2.msra.mxu1 %v145_v27  ;;  %v56_v27 = vld [vmem:[#allocation2 + $0xe0] sm:$0xff] }
  0x44   :  { %217 = vmatprep.subr.mxu0 %v664_v0  ;;  %598 = vmatprep.subr.mxu1 %v664_v0 }
  0x45   :  { %218 = vmatpush2.msra.mxu0 %v144_v28  ;;  %630 = vmatpush2.msra.mxu1 %v144_v28  ;;  %v104_v28 = vld [vmem:[#allocation2 + $0x260] sm:$0xff] }
  0x46   :  { %219 = vmatprep.subr.mxu0 %v664_v0  ;;  %599 = vmatprep.subr.mxu1 %v664_v0 }
  0x47   :  { %220 = vmatpush2.msra.mxu0 %v143_v29  ;;  %631 = vmatpush2.msra.mxu1 %v143_v29  ;;  %v59_v29 = vld [vmem:[#allocation2 + $0xf8] sm:$0xff] }
  0x48   :  { %221 = vmatprep.subr.mxu0 %v664_v0  ;;  %600 = vmatprep.subr.mxu1 %v664_v0 }
  0x49   :  { %222 = vmatpush2.msra.mxu0 %v142_v30  ;;  %632 = vmatpush2.msra.mxu1 %v142_v30  ;;  %v107_v30 = vld [vmem:[#allocation2 + $0x278] sm:$0xff] }
  0x4a   :  { %223 = vmatprep.subr.mxu0 %v664_v0  ;;  %601 = vmatprep.subr.mxu1 %v664_v0 }
  0x4b   :  { %224 = vmatpush2.msra.mxu0 %v141_v31  ;;  %633 = vmatpush2.msra.mxu1 %v141_v31  ;;  %v58_v31 = vld [vmem:[#allocation2 + $0xf0] sm:$0xff] }
  0x4c   :  { %225 = vmatprep.subr.mxu0 %v664_v0  ;;  %602 = vmatprep.subr.mxu1 %v664_v0  ;;  %v90_v0 = vld [vmem:[#allocation2 + $0x1f0] sm:$0xff] }
  0x4d   :  { %226 = vmatpush2.msra.mxu0 %v140_v32  ;;  %634 = vmatpush2.msra.mxu1 %v140_v32  ;;  %v106_v32 = vld [vmem:[#allocation2 + $0x270] sm:$0xff] }
  0x4e   :  { %227 = vmatprep.mubr.f32.mxu0 %v29_v33  ;;  %347 = vmatprep.mubr.f32.mxu1 %v77_v34  ;;  %v61_v33 = vld [vmem:[#allocation2 + $0x108] sm:$0xff] }
  0x4f   :  { %228 = vmatmul.mubr.f32.vlgmr.msra.gmra.mxu0 %v28_v35  ;;  %348 = vmatmul.mubr.f32.vlgmr.msra.gmra.mxu1 %v76_v36  ;;  %v109_v34 = vld [vmem:[#allocation2 + $0x288] sm:$0xff]  ;;  %v60_v35 = vld [vmem:[#allocation2 + $0x100] sm:$0xff] }
  0x50   :  { %232 = vmatprep.mubr.f32.mxu0 %v31_v37  ;;  %352 = vmatprep.mubr.f32.mxu1 %v79_v38  ;;  %v108_v36 = vld [vmem:[#allocation2 + $0x280] sm:$0xff]  ;;  %v63_v37 = vld [vmem:[#allocation2 + $0x118] sm:$0xff] }
  0x51   :  { %v111_v38 = vld [vmem:[#allocation2 + $0x298] sm:$0xff] }
  0x53   :  { %233 = vmatmul.mubr.f32.gmra.mxu0 %v30_v39  ;;  %353 = vmatmul.mubr.f32.gmra.mxu1 %v78_v40  ;;  %v62_v39 = vld [vmem:[#allocation2 + $0x110] sm:$0xff] }
  0x54   :  { %237 = vmatprep.mubr.f32.mxu0 %v33_v41  ;;  %357 = vmatprep.mubr.f32.mxu1 %v81_v42  ;;  %v110_v40 = vld [vmem:[#allocation2 + $0x290] sm:$0xff]  ;;  %v65_v41 = vld [vmem:[#allocation2 + $0x128] sm:$0xff] }
  0x55   :  { %v113_v42 = vld [vmem:[#allocation2 + $0x2a8] sm:$0xff] }
  0x57   :  { %238 = vmatmul.mubr.f32.gmra.mxu0 %v32_v43  ;;  %358 = vmatmul.mubr.f32.gmra.mxu1 %v80_v44  ;;  %v64_v43 = vld [vmem:[#allocation2 + $0x120] sm:$0xff] }
  0x58   :  { %242 = vmatprep.mubr.f32.mxu0 %v35_v45  ;;  %362 = vmatprep.mubr.f32.mxu1 %v83_v46  ;;  %v112_v44 = vld [vmem:[#allocation2 + $0x2a0] sm:$0xff]  ;;  %v67_v45 = vld [vmem:[#allocation2 + $0x138] sm:$0xff] }
  0x59   :  { %v115_v46 = vld [vmem:[#allocation2 + $0x2b8] sm:$0xff] }
  0x5b   :  { %243 = vmatmul.mubr.f32.gmra.mxu0 %v34_v47  ;;  %363 = vmatmul.mubr.f32.gmra.mxu1 %v82_v48  ;;  %v66_v47 = vld [vmem:[#allocation2 + $0x130] sm:$0xff] }
  0x5c   :  { %247 = vmatprep.mubr.f32.mxu0 %v37_v49  ;;  %367 = vmatprep.mubr.f32.mxu1 %v85_v50  ;;  %v114_v48 = vld [vmem:[#allocation2 + $0x2b0] sm:$0xff]  ;;  %v69_v49 = vld [vmem:[#allocation2 + $0x148] sm:$0xff] }
  0x5d   :  { %v117_v50 = vld [vmem:[#allocation2 + $0x2c8] sm:$0xff] }
  0x5f   :  { %248 = vmatmul.mubr.f32.gmra.mxu0 %v36_v51  ;;  %368 = vmatmul.mubr.f32.gmra.mxu1 %v84_v52  ;;  %v68_v51 = vld [vmem:[#allocation2 + $0x140] sm:$0xff] }
  0x60   :  { %252 = vmatprep.mubr.f32.mxu0 %v39_v53  ;;  %372 = vmatprep.mubr.f32.mxu1 %v87_v54  ;;  %v116_v52 = vld [vmem:[#allocation2 + $0x2c0] sm:$0xff]  ;;  %v71_v53 = vld [vmem:[#allocation2 + $0x158] sm:$0xff] }
  0x61   :  { %v119_v54 = vld [vmem:[#allocation2 + $0x2d8] sm:$0xff] }
  0x63   :  { %253 = vmatmul.mubr.f32.gmra.mxu0 %v38_v55  ;;  %373 = vmatmul.mubr.f32.gmra.mxu1 %v86_v56  ;;  %v70_v55 = vld [vmem:[#allocation2 + $0x150] sm:$0xff] }
  0x64   :  { %257 = vmatprep.mubr.f32.mxu0 %v41_v57  ;;  %377 = vmatprep.mubr.f32.mxu1 %v89_v58  ;;  %v118_v56 = vld [vmem:[#allocation2 + $0x2d0] sm:$0xff]  ;;  %v73_v57 = vld [vmem:[#allocation2 + $0x168] sm:$0xff] }
  0x65   :  { %v121_v58 = vld [vmem:[#allocation2 + $0x2e8] sm:$0xff] }
  0x67   :  { %258 = vmatmul.mubr.f32.gmra.mxu0 %v40_v59  ;;  %378 = vmatmul.mubr.f32.gmra.mxu1 %v88_v60  ;;  %v72_v59 = vld [vmem:[#allocation2 + $0x160] sm:$0xff] }
  0x68   :  { %262 = vmatprep.mubr.f32.mxu0 %v43_v61  ;;  %382 = vmatprep.mubr.f32.mxu1 %v91_v62  ;;  %v120_v60 = vld [vmem:[#allocation2 + $0x2e0] sm:$0xff]  ;;  %v75_v61 = vld [vmem:[#allocation2 + $0x178] sm:$0xff] }
  0x69   :  { %v123_v62 = vld [vmem:[#allocation2 + $0x2f8] sm:$0xff] }
  0x6b   :  { %263 = vmatmul.mubr.f32.gmra.mxu0 %v42_v63  ;;  %383 = vmatmul.mubr.f32.gmra.mxu1 %v90_v0  ;;  %v74_v63 = vld [vmem:[#allocation2 + $0x170] sm:$0xff] }
  0x6c   :  { %267 = vmatprep.mubr.f32.mxu0 %v45_v1  ;;  %387 = vmatprep.mubr.f32.mxu1 %v93_v2  ;;  %v122_v0 = vld [vmem:[#allocation2 + $0x2f0] sm:$0xff]  ;;  %v851_v1 = vld [vmem:[%s1095_s2] ss:$0 sm:$0xff] }
  0x6f   :  { %268 = vmatmul.mubr.f32.gmra.mxu0 %v44_v3  ;;  %388 = vmatmul.mubr.f32.gmra.mxu1 %v92_v4 }
  0x70   :  { %272 = vmatprep.mubr.f32.mxu0 %v47_v5  ;;  %392 = vmatprep.mubr.f32.mxu1 %v95_v6 }
  0x73   :  { %273 = vmatmul.mubr.f32.gmra.mxu0 %v46_v7  ;;  %393 = vmatmul.mubr.f32.gmra.mxu1 %v94_v8 }
  0x74   :  { %277 = vmatprep.mubr.f32.mxu0 %v49_v9  ;;  %397 = vmatprep.mubr.f32.mxu1 %v97_v10 }
  0x77   :  { %278 = vmatmul.mubr.f32.gmra.mxu0 %v48_v11  ;;  %398 = vmatmul.mubr.f32.gmra.mxu1 %v96_v12 }
  0x78   :  { %282 = vmatprep.mubr.f32.mxu0 %v51_v13  ;;  %402 = vmatprep.mubr.f32.mxu1 %v99_v14 }
  0x7b   :  { %283 = vmatmul.mubr.f32.gmra.mxu0 %v50_v15  ;;  %403 = vmatmul.mubr.f32.gmra.mxu1 %v98_v16 }
  0x7c   :  { %287 = vmatprep.mubr.f32.mxu0 %v53_v17  ;;  %407 = vmatprep.mubr.f32.mxu1 %v101_v18 }
  0x7f   :  { %288 = vmatmul.mubr.f32.gmra.mxu0 %v52_v19  ;;  %408 = vmatmul.mubr.f32.gmra.mxu1 %v100_v20 }
  0x80   :  { %292 = vmatprep.mubr.f32.mxu0 %v55_v21  ;;  %412 = vmatprep.mubr.f32.mxu1 %v103_v22 }
  0x83   :  { %293 = vmatmul.mubr.f32.gmra.mxu0 %v54_v23  ;;  %413 = vmatmul.mubr.f32.gmra.mxu1 %v102_v24 }
  0x84   :  { %297 = vmatprep.mubr.f32.mxu0 %v57_v25  ;;  %417 = vmatprep.mubr.f32.mxu1 %v105_v26 }
  0x87   :  { %298 = vmatmul.mubr.f32.gmra.mxu0 %v56_v27  ;;  %418 = vmatmul.mubr.f32.gmra.mxu1 %v104_v28 }
  0x88   :  { %302 = vmatprep.mubr.f32.mxu0 %v59_v29  ;;  %422 = vmatprep.mubr.f32.mxu1 %v107_v30 }
  0x8b   :  { %303 = vmatmul.mubr.f32.gmra.mxu0 %v58_v31  ;;  %423 = vmatmul.mubr.f32.gmra.mxu1 %v106_v32 }
  0x8c   :  { %307 = vmatprep.mubr.f32.mxu0 %v61_v33  ;;  %427 = vmatprep.mubr.f32.mxu1 %v109_v34 }
  0x8f   :  { %308 = vmatmul.mubr.f32.gmra.mxu0 %v60_v35  ;;  %428 = vmatmul.mubr.f32.gmra.mxu1 %v108_v36 }
  0x90   :  { %312 = vmatprep.mubr.f32.mxu0 %v63_v37  ;;  %432 = vmatprep.mubr.f32.mxu1 %v111_v38 }
  0x93   :  { %313 = vmatmul.mubr.f32.gmra.mxu0 %v62_v39  ;;  %433 = vmatmul.mubr.f32.gmra.mxu1 %v110_v40 }
  0x94   :  { %317 = vmatprep.mubr.f32.mxu0 %v65_v41  ;;  %437 = vmatprep.mubr.f32.mxu1 %v113_v42 }
  0x97   :  { %318 = vmatmul.mubr.f32.gmra.mxu0 %v64_v43  ;;  %438 = vmatmul.mubr.f32.gmra.mxu1 %v112_v44 }
  0x98   :  { %322 = vmatprep.mubr.f32.mxu0 %v67_v45  ;;  %442 = vmatprep.mubr.f32.mxu1 %v115_v46 }
  0x9b   :  { %323 = vmatmul.mubr.f32.gmra.mxu0 %v66_v47  ;;  %443 = vmatmul.mubr.f32.gmra.mxu1 %v114_v48 }
  0x9c   :  { %327 = vmatprep.mubr.f32.mxu0 %v69_v49  ;;  %447 = vmatprep.mubr.f32.mxu1 %v117_v50 }
  0x9f   :  { %328 = vmatmul.mubr.f32.gmra.mxu0 %v68_v51  ;;  %448 = vmatmul.mubr.f32.gmra.mxu1 %v116_v52 }
  0xa0   :  { %332 = vmatprep.mubr.f32.mxu0 %v71_v53  ;;  %452 = vmatprep.mubr.f32.mxu1 %v119_v54 }
  0xa3   :  { %333 = vmatmul.mubr.f32.gmra.mxu0 %v70_v55  ;;  %453 = vmatmul.mubr.f32.gmra.mxu1 %v118_v56 }
  0xa4   :  { %337 = vmatprep.mubr.f32.mxu0 %v73_v57  ;;  %457 = vmatprep.mubr.f32.mxu1 %v121_v58 }
  0xa7   :  { %338 = vmatmul.mubr.f32.gmra.mxu0 %v72_v59  ;;  %458 = vmatmul.mubr.f32.gmra.mxu1 %v120_v60 }
  0xa8   :  { %342 = vmatprep.mubr.f32.mxu0 %v75_v61  ;;  %462 = vmatprep.mubr.f32.mxu1 %v123_v62 }
  0xab   :  { %343 = vmatmul.mubr.f32.gmra.mxu0 %v74_v63  ;;  %463 = vmatmul.mubr.f32.gmra.mxu1 %v122_v0 }
 0x10f   :  { %v229_v2 = vpop.f32.mrf.mxu0  ;;  %v349_v3 = vpop.f32.mrf.mxu1 }
 0x110   :  { %v230_v4 = vadd.f32 %v851_v1, %v229_v2  ;;  %v350_v5 = vadd.f32 %v851_v1, %v349_v3 }
 0x111   :  { %v231_v6 = vpop.f32.mrf.mxu0  ;;  %v351_v7 = vpop.f32.mrf.mxu1 }
 0x112   :  { %v468_v8 = vmax.f32 %v230_v4, 0.0  ;;  %v492_v9 = vmax.f32 %v350_v5, 0.0 }
 0x113   :  { %v234_v10 = vpop.f32.mrf.mxu0  ;;  %v354_v11 = vpop.f32.mrf.mxu1 }
 0x114   :  { %517 = vst.msk [vmem:[%s1096_s3] sm:$0xff] %vm516_vm0, %v468_v8  ;;  %541 = vst.msk [vmem:[%s1096_s3 + $0xc0] sm:$0xff] %vm516_vm0, %v492_v9  ;;  %v235_v12 = vadd.f32 %v851_v1, %v234_v10  ;;  %v355_v13 = vadd.f32 %v851_v1, %v354_v11 }
 0x115   :  { %v236_v14 = vpop.f32.mrf.mxu0  ;;  %v356_v15 = vpop.f32.mrf.mxu1 }
 0x116   :  { %v469_v16 = vmax.f32 %v235_v12, 0.0  ;;  %v493_v17 = vmax.f32 %v355_v13, 0.0 }
 0x117   :  { %v239_v18 = vpop.f32.mrf.mxu0  ;;  %v359_v19 = vpop.f32.mrf.mxu1 }
 0x118   :  { %518 = vst.msk [vmem:[%s1096_s3 + $0x8] sm:$0xff] %vm516_vm0, %v469_v16  ;;  %542 = vst.msk [vmem:[%s1096_s3 + $0xc8] sm:$0xff] %vm516_vm0, %v493_v17  ;;  %v240_v20 = vadd.f32 %v851_v1, %v239_v18  ;;  %v360_v21 = vadd.f32 %v851_v1, %v359_v19 }
 0x119   :  { %v241_v22 = vpop.f32.mrf.mxu0  ;;  %v361_v23 = vpop.f32.mrf.mxu1 }
 0x11a   :  { %v470_v24 = vmax.f32 %v240_v20, 0.0  ;;  %v494_v25 = vmax.f32 %v360_v21, 0.0 }
 0x11b   :  { %v244_v26 = vpop.f32.mrf.mxu0  ;;  %v364_v27 = vpop.f32.mrf.mxu1 }
 0x11c   :  { %519 = vst.msk [vmem:[%s1096_s3 + $0x10] sm:$0xff] %vm516_vm0, %v470_v24  ;;  %543 = vst.msk [vmem:[%s1096_s3 + $0xd0] sm:$0xff] %vm516_vm0, %v494_v25  ;;  %v245_v28 = vadd.f32 %v851_v1, %v244_v26  ;;  %v365_v29 = vadd.f32 %v851_v1, %v364_v27 }
 0x11d   :  { %v246_v30 = vpop.f32.mrf.mxu0  ;;  %v366_v31 = vpop.f32.mrf.mxu1 }
 0x11e   :  { %v471_v32 = vmax.f32 %v245_v28, 0.0  ;;  %v495_v33 = vmax.f32 %v365_v29, 0.0 }
 0x11f   :  { %v249_v34 = vpop.f32.mrf.mxu0  ;;  %v369_v35 = vpop.f32.mrf.mxu1 }
 0x120   :  { %520 = vst.msk [vmem:[%s1096_s3 + $0x18] sm:$0xff] %vm516_vm0, %v471_v32  ;;  %544 = vst.msk [vmem:[%s1096_s3 + $0xd8] sm:$0xff] %vm516_vm0, %v495_v33  ;;  %v250_v36 = vadd.f32 %v851_v1, %v249_v34  ;;  %v370_v37 = vadd.f32 %v851_v1, %v369_v35 }
 0x121   :  { %v251_v38 = vpop.f32.mrf.mxu0  ;;  %v371_v39 = vpop.f32.mrf.mxu1 }
 0x122   :  { %v472_v40 = vmax.f32 %v250_v36, 0.0  ;;  %v496_v41 = vmax.f32 %v370_v37, 0.0 }
 0x123   :  { %v254_v42 = vpop.f32.mrf.mxu0  ;;  %v374_v43 = vpop.f32.mrf.mxu1 }
 0x124   :  { %521 = vst.msk [vmem:[%s1096_s3 + $0x20] sm:$0xff] %vm516_vm0, %v472_v40  ;;  %545 = vst.msk [vmem:[%s1096_s3 + $0xe0] sm:$0xff] %vm516_vm0, %v496_v41  ;;  %v255_v44 = vadd.f32 %v851_v1, %v254_v42  ;;  %v375_v45 = vadd.f32 %v851_v1, %v374_v43 }
 0x125   :  { %v256_v46 = vpop.f32.mrf.mxu0  ;;  %v376_v47 = vpop.f32.mrf.mxu1 }
 0x126   :  { %v473_v48 = vmax.f32 %v255_v44, 0.0  ;;  %v497_v49 = vmax.f32 %v375_v45, 0.0 }
 0x127   :  { %v259_v50 = vpop.f32.mrf.mxu0  ;;  %v379_v51 = vpop.f32.mrf.mxu1 }
 0x128   :  { %522 = vst.msk [vmem:[%s1096_s3 + $0x28] sm:$0xff] %vm516_vm0, %v473_v48  ;;  %546 = vst.msk [vmem:[%s1096_s3 + $0xe8] sm:$0xff] %vm516_vm0, %v497_v49  ;;  %v260_v52 = vadd.f32 %v851_v1, %v259_v50  ;;  %v380_v53 = vadd.f32 %v851_v1, %v379_v51 }
 0x129   :  { %v261_v54 = vpop.f32.mrf.mxu0  ;;  %v381_v55 = vpop.f32.mrf.mxu1 }
 0x12a   :  { %v474_v56 = vmax.f32 %v260_v52, 0.0  ;;  %v498_v57 = vmax.f32 %v380_v53, 0.0 }
 0x12b   :  { %v264_v58 = vpop.f32.mrf.mxu0  ;;  %v384_v59 = vpop.f32.mrf.mxu1 }
 0x12c   :  { %523 = vst.msk [vmem:[%s1096_s3 + $0x30] sm:$0xff] %vm516_vm0, %v474_v56  ;;  %547 = vst.msk [vmem:[%s1096_s3 + $0xf0] sm:$0xff] %vm516_vm0, %v498_v57  ;;  %v265_v60 = vadd.f32 %v851_v1, %v264_v58  ;;  %v385_v61 = vadd.f32 %v851_v1, %v384_v59 }
 0x12d   :  { %v266_v62 = vpop.f32.mrf.mxu0  ;;  %v386_v63 = vpop.f32.mrf.mxu1 }
 0x12e   :  { %v475_v0 = vmax.f32 %v265_v60, 0.0  ;;  %v499_v2 = vmax.f32 %v385_v61, 0.0 }
 0x12f   :  { %v269_v3 = vpop.f32.mrf.mxu0  ;;  %v389_v4 = vpop.f32.mrf.mxu1 }
 0x130   :  { %524 = vst.msk [vmem:[%s1096_s3 + $0x38] sm:$0xff] %vm516_vm0, %v475_v0  ;;  %548 = vst.msk [vmem:[%s1096_s3 + $0xf8] sm:$0xff] %vm516_vm0, %v499_v2  ;;  %v270_v5 = vadd.f32 %v851_v1, %v269_v3  ;;  %v390_v6 = vadd.f32 %v851_v1, %v389_v4 }
 0x131   :  { %v271_v7 = vpop.f32.mrf.mxu0  ;;  %v391_v8 = vpop.f32.mrf.mxu1 }
 0x132   :  { %v476_v9 = vmax.f32 %v270_v5, 0.0  ;;  %v500_v10 = vmax.f32 %v390_v6, 0.0 }
 0x133   :  { %v274_v11 = vpop.f32.mrf.mxu0  ;;  %v394_v12 = vpop.f32.mrf.mxu1 }
 0x134   :  { %525 = vst.msk [vmem:[%s1096_s3 + $0x40] sm:$0xff] %vm516_vm0, %v476_v9  ;;  %549 = vst.msk [vmem:[%s1096_s3 + $0x100] sm:$0xff] %vm516_vm0, %v500_v10  ;;  %v275_v13 = vadd.f32 %v851_v1, %v274_v11  ;;  %v395_v14 = vadd.f32 %v851_v1, %v394_v12 }
 0x135   :  { %v276_v15 = vpop.f32.mrf.mxu0  ;;  %v396_v16 = vpop.f32.mrf.mxu1 }
 0x136   :  { %v477_v17 = vmax.f32 %v275_v13, 0.0  ;;  %v501_v18 = vmax.f32 %v395_v14, 0.0 }
 0x137   :  { %v279_v19 = vpop.f32.mrf.mxu0  ;;  %v399_v20 = vpop.f32.mrf.mxu1 }
 0x138   :  { %526 = vst.msk [vmem:[%s1096_s3 + $0x48] sm:$0xff] %vm516_vm0, %v477_v17  ;;  %550 = vst.msk [vmem:[%s1096_s3 + $0x108] sm:$0xff] %vm516_vm0, %v501_v18  ;;  %v280_v21 = vadd.f32 %v851_v1, %v279_v19  ;;  %v400_v22 = vadd.f32 %v851_v1, %v399_v20 }
 0x139   :  { %v281_v23 = vpop.f32.mrf.mxu0  ;;  %v401_v24 = vpop.f32.mrf.mxu1 }
 0x13a   :  { %v478_v25 = vmax.f32 %v280_v21, 0.0  ;;  %v502_v26 = vmax.f32 %v400_v22, 0.0 }
 0x13b   :  { %v284_v27 = vpop.f32.mrf.mxu0  ;;  %v404_v28 = vpop.f32.mrf.mxu1 }
 0x13c   :  { %527 = vst.msk [vmem:[%s1096_s3 + $0x50] sm:$0xff] %vm516_vm0, %v478_v25  ;;  %551 = vst.msk [vmem:[%s1096_s3 + $0x110] sm:$0xff] %vm516_vm0, %v502_v26  ;;  %v285_v29 = vadd.f32 %v851_v1, %v284_v27  ;;  %v405_v30 = vadd.f32 %v851_v1, %v404_v28 }
 0x13d   :  { %v286_v31 = vpop.f32.mrf.mxu0  ;;  %v406_v32 = vpop.f32.mrf.mxu1 }
 0x13e   :  { %v479_v33 = vmax.f32 %v285_v29, 0.0  ;;  %v503_v34 = vmax.f32 %v405_v30, 0.0 }
 0x13f   :  { %v289_v35 = vpop.f32.mrf.mxu0  ;;  %v409_v36 = vpop.f32.mrf.mxu1 }
 0x140   :  { %528 = vst.msk [vmem:[%s1096_s3 + $0x58] sm:$0xff] %vm516_vm0, %v479_v33  ;;  %552 = vst.msk [vmem:[%s1096_s3 + $0x118] sm:$0xff] %vm516_vm0, %v503_v34  ;;  %v290_v37 = vadd.f32 %v851_v1, %v289_v35  ;;  %v410_v38 = vadd.f32 %v851_v1, %v409_v36 }
 0x141   :  { %v291_v39 = vpop.f32.mrf.mxu0  ;;  %v411_v40 = vpop.f32.mrf.mxu1 }
 0x142   :  { %v480_v41 = vmax.f32 %v290_v37, 0.0  ;;  %v504_v42 = vmax.f32 %v410_v38, 0.0 }
 0x143   :  { %v294_v43 = vpop.f32.mrf.mxu0  ;;  %v414_v44 = vpop.f32.mrf.mxu1 }
 0x144   :  { %529 = vst.msk [vmem:[%s1096_s3 + $0x60] sm:$0xff] %vm516_vm0, %v480_v41  ;;  %553 = vst.msk [vmem:[%s1096_s3 + $0x120] sm:$0xff] %vm516_vm0, %v504_v42  ;;  %v295_v45 = vadd.f32 %v851_v1, %v294_v43  ;;  %v415_v46 = vadd.f32 %v851_v1, %v414_v44 }
 0x145   :  { %v296_v47 = vpop.f32.mrf.mxu0  ;;  %v416_v48 = vpop.f32.mrf.mxu1 }
 0x146   :  { %v481_v49 = vmax.f32 %v295_v45, 0.0  ;;  %v505_v50 = vmax.f32 %v415_v46, 0.0 }
 0x147   :  { %v299_v51 = vpop.f32.mrf.mxu0  ;;  %v419_v52 = vpop.f32.mrf.mxu1 }
 0x148   :  { %530 = vst.msk [vmem:[%s1096_s3 + $0x68] sm:$0xff] %vm516_vm0, %v481_v49  ;;  %554 = vst.msk [vmem:[%s1096_s3 + $0x128] sm:$0xff] %vm516_vm0, %v505_v50  ;;  %v300_v53 = vadd.f32 %v851_v1, %v299_v51  ;;  %v420_v54 = vadd.f32 %v851_v1, %v419_v52 }
 0x149   :  { %v301_v55 = vpop.f32.mrf.mxu0  ;;  %v421_v56 = vpop.f32.mrf.mxu1 }
 0x14a   :  { %v482_v57 = vmax.f32 %v300_v53, 0.0  ;;  %v506_v58 = vmax.f32 %v420_v54, 0.0 }
 0x14b   :  { %v304_v59 = vpop.f32.mrf.mxu0  ;;  %v424_v60 = vpop.f32.mrf.mxu1 }
 0x14c   :  { %531 = vst.msk [vmem:[%s1096_s3 + $0x70] sm:$0xff] %vm516_vm0, %v482_v57  ;;  %555 = vst.msk [vmem:[%s1096_s3 + $0x130] sm:$0xff] %vm516_vm0, %v506_v58  ;;  %v305_v61 = vadd.f32 %v851_v1, %v304_v59  ;;  %v425_v62 = vadd.f32 %v851_v1, %v424_v60 }
 0x14d   :  { %v306_v63 = vpop.f32.mrf.mxu0  ;;  %v426_v0 = vpop.f32.mrf.mxu1 }
 0x14e   :  { %v483_v2 = vmax.f32 %v305_v61, 0.0  ;;  %v507_v3 = vmax.f32 %v425_v62, 0.0 }
 0x14f   :  { %v309_v4 = vpop.f32.mrf.mxu0  ;;  %v429_v5 = vpop.f32.mrf.mxu1 }
 0x150   :  { %532 = vst.msk [vmem:[%s1096_s3 + $0x78] sm:$0xff] %vm516_vm0, %v483_v2  ;;  %556 = vst.msk [vmem:[%s1096_s3 + $0x138] sm:$0xff] %vm516_vm0, %v507_v3  ;;  %v310_v6 = vadd.f32 %v851_v1, %v309_v4  ;;  %v430_v7 = vadd.f32 %v851_v1, %v429_v5 }
 0x151   :  { %v311_v8 = vpop.f32.mrf.mxu0  ;;  %v431_v9 = vpop.f32.mrf.mxu1 }
 0x152   :  { %v484_v10 = vmax.f32 %v310_v6, 0.0  ;;  %v508_v11 = vmax.f32 %v430_v7, 0.0 }
 0x153   :  { %v314_v12 = vpop.f32.mrf.mxu0  ;;  %v434_v13 = vpop.f32.mrf.mxu1 }
 0x154   :  { %533 = vst.msk [vmem:[%s1096_s3 + $0x80] sm:$0xff] %vm516_vm0, %v484_v10  ;;  %557 = vst.msk [vmem:[%s1096_s3 + $0x140] sm:$0xff] %vm516_vm0, %v508_v11  ;;  %v315_v14 = vadd.f32 %v851_v1, %v314_v12  ;;  %v435_v15 = vadd.f32 %v851_v1, %v434_v13 }
 0x155   :  { %v316_v16 = vpop.f32.mrf.mxu0  ;;  %v436_v17 = vpop.f32.mrf.mxu1 }
 0x156   :  { %v485_v18 = vmax.f32 %v315_v14, 0.0  ;;  %v509_v19 = vmax.f32 %v435_v15, 0.0 }
 0x157   :  { %v319_v20 = vpop.f32.mrf.mxu0  ;;  %v439_v21 = vpop.f32.mrf.mxu1 }
 0x158   :  { %534 = vst.msk [vmem:[%s1096_s3 + $0x88] sm:$0xff] %vm516_vm0, %v485_v18  ;;  %558 = vst.msk [vmem:[%s1096_s3 + $0x148] sm:$0xff] %vm516_vm0, %v509_v19  ;;  %v320_v22 = vadd.f32 %v851_v1, %v319_v20  ;;  %v440_v23 = vadd.f32 %v851_v1, %v439_v21 }
 0x159   :  { %v321_v24 = vpop.f32.mrf.mxu0  ;;  %v441_v25 = vpop.f32.mrf.mxu1 }
 0x15a   :  { %v486_v26 = vmax.f32 %v320_v22, 0.0  ;;  %v510_v27 = vmax.f32 %v440_v23, 0.0 }
 0x15b   :  { %v324_v28 = vpop.f32.mrf.mxu0  ;;  %v444_v29 = vpop.f32.mrf.mxu1 }
 0x15c   :  { %535 = vst.msk [vmem:[%s1096_s3 + $0x90] sm:$0xff] %vm516_vm0, %v486_v26  ;;  %559 = vst.msk [vmem:[%s1096_s3 + $0x150] sm:$0xff] %vm516_vm0, %v510_v27  ;;  %v325_v30 = vadd.f32 %v851_v1, %v324_v28  ;;  %v445_v31 = vadd.f32 %v851_v1, %v444_v29 }
 0x15d   :  { %v326_v32 = vpop.f32.mrf.mxu0  ;;  %v446_v33 = vpop.f32.mrf.mxu1 }
 0x15e   :  { %v487_v34 = vmax.f32 %v325_v30, 0.0  ;;  %v511_v35 = vmax.f32 %v445_v31, 0.0 }
 0x15f   :  { %v329_v36 = vpop.f32.mrf.mxu0  ;;  %v449_v37 = vpop.f32.mrf.mxu1 }
 0x160   :  { %536 = vst.msk [vmem:[%s1096_s3 + $0x98] sm:$0xff] %vm516_vm0, %v487_v34  ;;  %560 = vst.msk [vmem:[%s1096_s3 + $0x158] sm:$0xff] %vm516_vm0, %v511_v35  ;;  %v330_v38 = vadd.f32 %v851_v1, %v329_v36  ;;  %v450_v39 = vadd.f32 %v851_v1, %v449_v37 }
 0x161   :  { %v331_v40 = vpop.f32.mrf.mxu0  ;;  %v451_v41 = vpop.f32.mrf.mxu1 }
 0x162   :  { %v488_v42 = vmax.f32 %v330_v38, 0.0  ;;  %v512_v43 = vmax.f32 %v450_v39, 0.0 }
 0x163   :  { %v334_v44 = vpop.f32.mrf.mxu0  ;;  %v454_v45 = vpop.f32.mrf.mxu1 }
 0x164   :  { %537 = vst.msk [vmem:[%s1096_s3 + $0xa0] sm:$0xff] %vm516_vm0, %v488_v42  ;;  %561 = vst.msk [vmem:[%s1096_s3 + $0x160] sm:$0xff] %vm516_vm0, %v512_v43  ;;  %v335_v46 = vadd.f32 %v851_v1, %v334_v44  ;;  %v455_v47 = vadd.f32 %v851_v1, %v454_v45 }
 0x165   :  { %v336_v48 = vpop.f32.mrf.mxu0  ;;  %v456_v49 = vpop.f32.mrf.mxu1 }
 0x166   :  { %v489_v50 = vmax.f32 %v335_v46, 0.0  ;;  %v513_v51 = vmax.f32 %v455_v47, 0.0 }
 0x167   :  { %v339_v52 = vpop.f32.mrf.mxu0  ;;  %v459_v53 = vpop.f32.mrf.mxu1 }
 0x168   :  { %538 = vst.msk [vmem:[%s1096_s3 + $0xa8] sm:$0xff] %vm516_vm0, %v489_v50  ;;  %562 = vst.msk [vmem:[%s1096_s3 + $0x168] sm:$0xff] %vm516_vm0, %v513_v51  ;;  %v340_v54 = vadd.f32 %v851_v1, %v339_v52  ;;  %v460_v55 = vadd.f32 %v851_v1, %v459_v53 }
 0x169   :  { %v341_v56 = vpop.f32.mrf.mxu0  ;;  %v461_v57 = vpop.f32.mrf.mxu1 }
 0x16a   :  { %v490_v58 = vmax.f32 %v340_v54, 0.0  ;;  %v514_v59 = vmax.f32 %v460_v55, 0.0 }
 0x16b   :  { %v344_v60 = vpop.f32.mrf.mxu0  ;;  %v464_v61 = vpop.f32.mrf.mxu1 }
 0x16c   :  { %539 = vst.msk [vmem:[%s1096_s3 + $0xb0] sm:$0xff] %vm516_vm0, %v490_v58  ;;  %563 = vst.msk [vmem:[%s1096_s3 + $0x170] sm:$0xff] %vm516_vm0, %v514_v59  ;;  %v345_v62 = vadd.f32 %v851_v1, %v344_v60  ;;  %v465_v63 = vadd.f32 %v851_v1, %v464_v61 }
 0x16d   :  { %v346_v0 = vpop.f32.mrf.mxu0  ;;  %v466_v2 = vpop.f32.mrf.mxu1 }
 0x16e   :  { %v491_v3 = vmax.f32 %v345_v62, 0.0  ;;  %v515_v4 = vmax.f32 %v465_v63, 0.0 }
 0x170   :  { %540 = vst.msk [vmem:[%s1096_s3 + $0xb8] sm:$0xff] %vm516_vm0, %v491_v3  ;;  %564 = vst.msk [vmem:[%s1096_s3 + $0x178] sm:$0xff] %vm516_vm0, %v515_v4 }
 0x171   :  { %569 = vsyncpa [#allocation3], 1 }

</bundles_post_ra>
